<compile_context>
chip_gen: v6e
topology: v6e:2x2x1
jax: 0.10.0
libtpu: 0.0.40
codegen_flags: <defaults>
</compile_context>

<pallas_src>
import functools
import math

import jax
import jax.numpy as jnp
from jax import lax
from jax.experimental import pallas as pl
from jax.experimental.pallas import tpu as pltpu


def _round_up(x, m):
    return ((x + m - 1) // m) * m


def _auc_loss_kernel(t_ref, r_ref, sum_ref, rat_ref, *,
                     rows, tile_rows, blocks_per_core, lane, needs_mask):
    i = pl.program_id(1)

    @pl.when(i == 0)
    def _():
        # Per-core partial accumulators live in the (revisited) output blocks.
        sum_ref[...] = jnp.zeros_like(sum_ref)
        rat_ref[...] = jnp.zeros_like(rat_ref)

    t = t_ref[...].astype(jnp.float32)
    r = r_ref[...].astype(jnp.float32)

    d = jnp.minimum(r - t, 0.0)
    dd = d * d

    if needs_mask:
        # Global row index derived from the *unclamped* block id so that the
        # grid-tail / duplicated blocks contribute exactly zero.
        c = pl.program_id(0)
        row0 = (c * blocks_per_core + i) * tile_rows
        row = row0 + lax.broadcasted_iota(jnp.int32, t.shape, 0)
        valid = row < rows
        t = jnp.where(valid, t, 0.0)
        dd = jnp.where(valid, dd, 0.0)

    # Fold the (tile_rows, L) tile into vreg-height (8, L) partials using only
    # elementwise VPU adds; the final cross-lane reduce happens in the wrapper
    # on tiny (2, 8, L) arrays.
    n = tile_rows // 8
    sum_ref[...] += jnp.sum(t.reshape(n, 8, lane), axis=0)
    rat_ref[...] += jnp.sum(dd.reshape(n, 8, lane), axis=0)


def auc_loss(t, results, lam_b=100.0, lam_r=100.0, *, tile_rows=None):
    t = jnp.asarray(t)
    results = jnp.asarray(results)
    assert t.shape == results.shape

    n_elem = int(math.prod(t.shape)) if t.ndim else 1
    t_flat = t.reshape(-1)
    r_flat = results.reshape(-1)

    # Lane-dense 2D view: (rows, L) with L a multiple of 128.
    lane = None
    for cand in (512, 256, 128):
        if n_elem >= cand and n_elem % cand == 0:
            lane = cand
            break
    if lane is None:
        # Zero-pad (zeros contribute 0 to both terms, so no extra masking).
        lane = 128
        n_pad = _round_up(max(n_elem, 1), lane)
        t_flat = jnp.pad(t_flat, (0, n_pad - n_elem))
        r_flat = jnp.pad(r_flat, (0, n_pad - n_elem))
        n_elem = n_pad
    rows = n_elem // lane
    t2 = t_flat.reshape(rows, lane)
    r2 = r_flat.reshape(rows, lane)

    # Dtype-aware row multiple (8 for f32, 16 for bf16, 32 for int8/fp8).
    min_itemsize = min(t2.dtype.itemsize, r2.dtype.itemsize)
    row_mult = max(8, 32 // max(1, min_itemsize))

    if tile_rows is None:
        # ~1M elements per block (4 MiB f32 / 2 MiB bf16 input tiles).
        target_elems = 1 << 20
        tile_rows = max(row_mult,
                        (target_elems // lane) // row_mult * row_mult)
    tile_rows = min(int(tile_rows), _round_up(rows, row_mult))
    tile_rows = max(row_mult, (tile_rows // row_mult) * row_mult)
    assert tile_rows % 8 == 0

    total_blocks = pl.cdiv(rows, tile_rows)
    blocks_per_core = pl.cdiv(total_blocks, 2)
    grid = (2, blocks_per_core)            # ("parallel", "arbitrary")
    needs_mask = (2 * blocks_per_core * tile_rows) != rows

    def in_index_map(c, i):
        # Clamp so the second core's spare trailing block never indexes past
        # the array; the in-kernel row mask zeroes its contribution.
        return (jnp.minimum(c * blocks_per_core + i, total_blocks - 1), 0)

    in_block_bytes = tile_rows * lane * (t2.dtype.itemsize + r2.dtype.itemsize)
    f32_block_bytes = tile_rows * lane * 4
    vmem_limit = int(min(48 << 20,
                         max(16 << 20,
                             2 * in_block_bytes + 8 * f32_block_bytes
                             + (2 << 20))))

    kernel = functools.partial(
        _auc_loss_kernel,
        rows=rows, tile_rows=tile_rows, blocks_per_core=blocks_per_core,
        lane=lane, needs_mask=needs_mask)

    sum_part, rat_part = pl.pallas_call(
        kernel,
        out_shape=(jax.ShapeDtypeStruct((2, 8, lane), jnp.float32),
                   jax.ShapeDtypeStruct((2, 8, lane), jnp.float32)),
        grid_spec=pltpu.PrefetchScalarGridSpec(
            num_scalar_prefetch=0,
            grid=grid,
            in_specs=[
                pl.BlockSpec((tile_rows, lane), in_index_map),
                pl.BlockSpec((tile_rows, lane), in_index_map),
            ],
            out_specs=[
                pl.BlockSpec((None, 8, lane), lambda c, i: (c, 0, 0)),
                pl.BlockSpec((None, 8, lane), lambda c, i: (c, 0, 0)),
            ],
        ),
        compiler_params=pltpu.CompilerParams(
            dimension_semantics=("parallel", "arbitrary"),
            vmem_limit_bytes=vmem_limit),
        cost_estimate=pl.CostEstimate(
            flops=5 * n_elem,
            transcendentals=0,
            bytes_accessed=n_elem * (t2.dtype.itemsize + r2.dtype.itemsize)),
    )(t2, r2)

    # Per-core partials are linear; min(sum,0)^2 is nonlinear so it must be
    # applied to the GLOBAL sum here, not per core.
    s = jnp.sum(sum_part)
    rat = jnp.sum(rat_part)
    bb = jnp.square(jnp.minimum(s, 0.0))
    loss = s + jnp.float32(lam_b) * bb + jnp.float32(lam_r) * rat
    return loss.reshape(1)   # matches PyTorch output shape [1]


def _auc_loss_ref(t, results, lam_b=100.0, lam_r=100.0):
    t = jnp.asarray(t).astype(jnp.float32)
    results = jnp.asarray(results).astype(jnp.float32)
    sum_t = jnp.sum(t)
    budget_balanced = jnp.square(jnp.minimum(sum_t, 0.0))
    rationality = jnp.sum(jnp.square(jnp.minimum(results - t, 0.0)))
    return (sum_t + lam_b * budget_balanced + lam_r * rationality).reshape(1)


def _check(name, t, results, **kw):
    ref = _auc_loss_ref(t, results)
    out = auc_loss(t, results, **kw)
    jax.block_until_ready(out)
    assert jnp.allclose(out, ref, rtol=1e-3, atol=1e-2), (name, out, ref)


if __name__ == "__main__":
    key = jax.random.PRNGKey(0)
    k1, k2, k3, k4, k5, k6, k7, k8 = jax.random.split(key, 8)

    # 1) Small 2D input, auto tile path (partial tail block + masked dup block).
    t = jax.random.normal(k1, (300, 128), dtype=jnp.float32)
    r = jax.random.normal(k2, (300, 128), dtype=jnp.float32)
    _check("auto", t, r)

    # 2) Forced small tiles: multi-step accumulation, odd block count split
    #    across the two-way parallel axis (clamped + masked spare block).
    _check("small_tiles", t, r, tile_rows=16)

    # 3) Non-128-divisible element count: zero-pad lane-dense fallback.
    t3 = jax.random.normal(k3, (7, 13), dtype=jnp.float32)
    r3 = jax.random.normal(k4, (7, 13), dtype=jnp.float32)
    _check("padded", t3, r3)

    # 4) bf16 inputs: dtype-aware (16-row) tiling, f32 accumulation.
    t4 = jax.random.normal(k5, (16, 40), dtype=jnp.float32).astype(jnp.bfloat16)
    r4 = jax.random.normal(k6, (16, 40), dtype=jnp.float32).astype(jnp.bfloat16)
    _check("bf16", t4, r4)

    # 5) Larger input: exercises the full-size (~4 MiB) block path with one
    #    real block per core and no masking.
    t5 = jax.random.normal(k7, (2048, 1024), dtype=jnp.float32)
    r5 = jax.random.normal(k8, (2048, 1024), dtype=jnp.float32)
    _check("large", t5, r5)

    print("KERNEL_OK")
</pallas_src>

<mosaic_0001>
module attributes {stable_mosaic.version = 11 : i64} {
  func.func @_auc_loss_kernel(%arg0: i32, %arg1: i32, %arg2: memref<80x512xf32, #tpu.memory_space<vmem>>, %arg3: memref<80x512xf32, #tpu.memory_space<vmem>>, %arg4: memref<1x8x512xf32, #tpu.memory_space<vmem>>, %arg5: memref<1x8x512xf32, #tpu.memory_space<vmem>>) attributes {dimension_semantics = [#tpu.dimension_semantics<parallel>, #tpu.dimension_semantics<arbitrary>], iteration_bounds = array<i64: 2, 1>, scalar_prefetch = 0 : i64, scratch_operands = 0 : i64, tpu.core_type = #tpu.core_type<tc>, window_params = [{transform_indices = @transform_0, window_bounds = array<i64: 80, 512>}, {transform_indices = @transform_1, window_bounds = array<i64: 80, 512>}, {transform_indices = @transform_2, window_bounds = array<i64: 1, 8, 512>}, {transform_indices = @transform_3, window_bounds = array<i64: 1, 8, 512>}]} {
    %c0_i32 = arith.constant 0 : i32
    %0 = arith.cmpi eq, %arg1, %c0_i32 : i32
    %1 = arith.extui %0 : i1 to i32
    %c0_i32_0 = arith.constant 0 : i32
    %2 = arith.cmpi ne, %1, %c0_i32_0 : i32
    scf.if %2 {
      %cst_20 = arith.constant 0.000000e+00 : f32
      %37 = vector.broadcast %cst_20 : f32 to vector<8x512xf32>
      %c0_21 = arith.constant 0 : index
      %c0_22 = arith.constant 0 : index
      %c0_23 = arith.constant 0 : index
      %38 = vector.load %arg4[%c0_21, %c0_22, %c0_23] : memref<1x8x512xf32, #tpu.memory_space<vmem>>, vector<1x8x512xf32>
      %39 = vector.shape_cast %38 : vector<1x8x512xf32> to vector<8x512xf32>
      %40 = vector.shape_cast %37 : vector<8x512xf32> to vector<1x8x512xf32>
      tpu.vector_store %arg4[%c0_21, %c0_22, %c0_23], %40 {strides = array<i32>} : memref<1x8x512xf32, #tpu.memory_space<vmem>>, vector<1x8x512xf32>,
      %cst_24 = arith.constant 0.000000e+00 : f32
      %41 = vector.broadcast %cst_24 : f32 to vector<8x512xf32>
      %c0_25 = arith.constant 0 : index
      %c0_26 = arith.constant 0 : index
      %c0_27 = arith.constant 0 : index
      %42 = vector.load %arg5[%c0_25, %c0_26, %c0_27] : memref<1x8x512xf32, #tpu.memory_space<vmem>>, vector<1x8x512xf32>
      %43 = vector.shape_cast %42 : vector<1x8x512xf32> to vector<8x512xf32>
      %44 = vector.shape_cast %41 : vector<8x512xf32> to vector<1x8x512xf32>
      tpu.vector_store %arg5[%c0_25, %c0_26, %c0_27], %44 {strides = array<i32>} : memref<1x8x512xf32, #tpu.memory_space<vmem>>, vector<1x8x512xf32>,
    } else {
    }
    %c0 = arith.constant 0 : index
    %c0_1 = arith.constant 0 : index
    %3 = vector.load %arg2[%c0, %c0_1] : memref<80x512xf32, #tpu.memory_space<vmem>>, vector<80x512xf32>
    %c0_2 = arith.constant 0 : index
    %c0_3 = arith.constant 0 : index
    %4 = vector.load %arg3[%c0_2, %c0_3] : memref<80x512xf32, #tpu.memory_space<vmem>>, vector<80x512xf32>
    %5 = arith.subf %4, %3 : vector<80x512xf32>
    %cst = arith.constant 0.000000e+00 : f32
    %6 = vector.broadcast %cst : f32 to vector<80x512xf32>
    %7 = arith.minimumf %5, %6 : vector<80x512xf32>
    %8 = arith.mulf %7, %7 : vector<80x512xf32>
    %c1_i32 = arith.constant 1 : i32
    %9 = arith.muli %arg0, %c1_i32 : i32
    %10 = arith.addi %9, %arg1 : i32
    %c80_i32 = arith.constant 80 : i32
    %11 = arith.muli %10, %c80_i32 : i32
    %12 = tpu.iota {dimensions = array<i32: 0>} : vector<80x512xi32>
    %13 = vector.broadcast %11 : i32 to vector<80x512xi32>
    %14 = arith.addi %13, %12 : vector<80x512xi32>
    %c75_i32 = arith.constant 75 : i32
    %15 = vector.broadcast %c75_i32 : i32 to vector<80x512xi32>
    %16 = arith.cmpi slt, %14, %15 : vector<80x512xi32>
    %cst_4 = arith.constant 0.000000e+00 : f32
    %17 = vector.broadcast %cst_4 : f32 to vector<80x512xf32>
    %18 = arith.select %16, %3, %17 : vector<80x512xi1>, vector<80x512xf32>
    %cst_5 = arith.constant 0.000000e+00 : f32
    %19 = vector.broadcast %cst_5 : f32 to vector<80x512xf32>
    %20 = arith.select %16, %8, %19 : vector<80x512xi1>, vector<80x512xf32>
    %c0_6 = arith.constant 0 : index
    %c0_7 = arith.constant 0 : index
    %c0_8 = arith.constant 0 : index
    %21 = vector.load %arg4[%c0_6, %c0_7, %c0_8] : memref<1x8x512xf32, #tpu.memory_space<vmem>>, vector<1x8x512xf32>
    %22 = vector.shape_cast %21 : vector<1x8x512xf32> to vector<8x512xf32>
    %23 = vector.shape_cast %18 : vector<80x512xf32> to vector<10x8x512xf32>
    %cst_9 = arith.constant dense<0.000000e+00> : vector<8x512xf32>
    %24 = vector.multi_reduction <add>, %23, %cst_9 [0] : vector<10x8x512xf32> to vector<8x512xf32>
    %25 = arith.addf %22, %24 : vector<8x512xf32>
    %c0_10 = arith.constant 0 : index
    %c0_11 = arith.constant 0 : index
    %c0_12 = arith.constant 0 : index
    %26 = vector.load %arg4[%c0_10, %c0_11, %c0_12] : memref<1x8x512xf32, #tpu.memory_space<vmem>>, vector<1x8x512xf32>
    %27 = vector.shape_cast %26 : vector<1x8x512xf32> to vector<8x512xf32>
    %28 = vector.shape_cast %25 : vector<8x512xf32> to vector<1x8x512xf32>
    tpu.vector_store %arg4[%c0_10, %c0_11, %c0_12], %28 {strides = array<i32>} : memref<1x8x512xf32, #tpu.memory_space<vmem>>, vector<1x8x512xf32>,
    %c0_13 = arith.constant 0 : index
    %c0_14 = arith.constant 0 : index
    %c0_15 = arith.constant 0 : index
    %29 = vector.load %arg5[%c0_13, %c0_14, %c0_15] : memref<1x8x512xf32, #tpu.memory_space<vmem>>, vector<1x8x512xf32>
    %30 = vector.shape_cast %29 : vector<1x8x512xf32> to vector<8x512xf32>
    %31 = vector.shape_cast %20 : vector<80x512xf32> to vector<10x8x512xf32>
    %cst_16 = arith.constant dense<0.000000e+00> : vector<8x512xf32>
    %32 = vector.multi_reduction <add>, %31, %cst_16 [0] : vector<10x8x512xf32> to vector<8x512xf32>
    %33 = arith.addf %30, %32 : vector<8x512xf32>
    %c0_17 = arith.constant 0 : index
    %c0_18 = arith.constant 0 : index
    %c0_19 = arith.constant 0 : index
    %34 = vector.load %arg5[%c0_17, %c0_18, %c0_19] : memref<1x8x512xf32, #tpu.memory_space<vmem>>, vector<1x8x512xf32>
    %35 = vector.shape_cast %34 : vector<1x8x512xf32> to vector<8x512xf32>
    %36 = vector.shape_cast %33 : vector<8x512xf32> to vector<1x8x512xf32>
    tpu.vector_store %arg5[%c0_17, %c0_18, %c0_19], %36 {strides = array<i32>} : memref<1x8x512xf32, #tpu.memory_space<vmem>>, vector<1x8x512xf32>,
    return
  }
  func.func @transform_0(%arg0: i32, %arg1: i32) -> (i32, i32) {
    %c1_i32 = arith.constant 1 : i32
    %0 = arith.muli %arg0, %c1_i32 : i32
    %1 = arith.addi %0, %arg1 : i32
    %c0_i32 = arith.constant 0 : i32
    %2 = arith.minsi %1, %c0_i32 : i32
    %c0_i32_0 = arith.constant 0 : i32
    %c0_i32_1 = arith.constant 0 : i32
    return %2, %c0_i32_0 : i32, i32
  }
  func.func @transform_1(%arg0: i32, %arg1: i32) -> (i32, i32) {
    %c1_i32 = arith.constant 1 : i32
    %0 = arith.muli %arg0, %c1_i32 : i32
    %1 = arith.addi %0, %arg1 : i32
    %c0_i32 = arith.constant 0 : i32
    %2 = arith.minsi %1, %c0_i32 : i32
    %c0_i32_0 = arith.constant 0 : i32
    %c0_i32_1 = arith.constant 0 : i32
    return %2, %c0_i32_0 : i32, i32
  }
  func.func @transform_2(%arg0: i32, %arg1: i32) -> (i32, i32, i32) {
    %c0_i32 = arith.constant 0 : i32
    %c0_i32_0 = arith.constant 0 : i32
    %c0_i32_1 = arith.constant 0 : i32
    return %arg0, %c0_i32, %c0_i32_0 : i32, i32, i32
  }
  func.func @transform_3(%arg0: i32, %arg1: i32) -> (i32, i32, i32) {
    %c0_i32 = arith.constant 0 : i32
    %c0_i32_0 = arith.constant 0 : i32
    %c0_i32_1 = arith.constant 0 : i32
    return %arg0, %c0_i32, %c0_i32_0 : i32, i32, i32
  }
}

</mosaic_0001>

<bundles_post_ra>
// kernel: tpu_custom_call.1
= control target key start
LH: loop header
LB: loop body
LE: loop exit
PB: predicated region body
PF: predicated region fallthrough
CT: control target
= control target key end

     0   :  { %9 = vsyncpa [#allocation3], 0  ;;  %s2115_s0 = inlined_call_operand.hbm [shape: f32[75,512], index: 0, kind: input, shape index: {}]   ;;  %s2116_s1 = inlined_call_operand.hbm [shape: f32[75,512], index: 1, kind: input, shape index: {}]   ;;  %s2117_s2 = inlined_call_operand.hbm [shape: f32[2,8,512], index: 2, kind: output, shape index: {0}]   ;;  %s2118_s3 = inlined_call_operand.hbm [shape: f32[2,8,512], index: 3, kind: output, shape index: {1}]  }
   0x1   :  { %11 = vsyncpa [#allocation3 + $0x1], 0 }
   0x2   :  { %12 = vsyncpa [#allocation6], 0 }
   0x3   :  { %14 = vsyncpa [#allocation6 + $0x1], 0 }
   0x4   :  { %15 = vsyncpa [#allocation4], 0 }
   0x5   :  { %17 = vsyncpa [#allocation4 + $0x1], 0 }
   0x6   :  { %18 = vsyncpa [#allocation9], 0 }
   0x7   :  { %20 = vsyncpa [#allocation9 + $0x1], 0  ;;  %s1217_s12 = smov 0   ;;  %s1219_s13 = smov 0  }
   0x8   :  { %s1221_s14 = smov 0   ;;  %s1223_s15 = smov 0  }
   0x9   :  { %s1225_s16 = smov 0   ;;  %s1227_s17 = smov 0  }
   0xa   :  { %s1229_s18 = smov 0   ;;  %s1231_s19 = smov 0  }
   0xb LB: > { %s869_s20 = sadd.s32 4294967295, %s1189_s19   ;;  %s870_s21 = sadd.s32 4294967294, %s1189_s19   ;;  %s1189_s19 = sphi %s1231_s19, %s26_s19   ;;  %s1185_s18 = sphi %s1229_s18, %s2287_s18   ;;  %s1181_s17 = sphi %s1227_s17, %s2286_s17   ;;  %s1177_s16 = sphi %s1225_s16, %s2105_s16   ;;  %s1173_s15 = sphi %s1223_s15, %s2285_s15   ;;  %s1169_s14 = sphi %s1221_s14, %s2284_s14   ;;  %s1165_s13 = sphi %s1219_s13, %s2283_s13   ;;  %s1161_s12 = sphi %s1217_s12, %s2282_s12  }
   0xc   : > { %s38_s22 = sadd.s32 1, %s1185_s18  ;;  %p1158_p1 = scmp.ne.s32.totalorder %s1177_s16, 0 }
   0xd   : > { %p40_p0 = scmp.ge.s32.totalorder %s38_s22, 2  ;;  %p59_p2 = scmp.eq.s32.totalorder %s1189_s19, 0 }
   0xe   : > { %p64_p3 = scmp.ne.s32.totalorder %s1177_s16, %s1173_s15  ;;  %p65_p5 = scmp.eq.s32.totalorder %s869_s20, 0 }
   0xf   : > { %s2289_s22 = smov (%p40_p0, %s38_s22), 0  ;;  %p1263_p4 = por %p1158_p1, %p59_p2 }
  0x10   : > { %p1267_p6 = por %p65_p5, %p64_p3  ;;  %s106_s25 = ssub.s32 %s1185_s18, %s2289_s22 }
  0x11   : > { %p107_p7 = scmp.eq.s32.totalorder %s106_s25, 0  ;;  %s109_s26 = sadd.s32 1, %s1169_s14 }
  0x12   : > { %s2160_s24 = scalar_select %p1267_p6, 1, 0 }
  0x13   : > { %s1275_s27 = scalar_select %p107_p7, %s1169_s14, %s109_s26  }
  0x14   : > { %p119_p8 = scmp.ne.s32.totalorder %s1169_s14, %s1165_s13  ;;  %p120_p9 = scmp.eq.s32.totalorder %s869_s20, 1 }
  0x15   : > { %p125_p10 = scmp.ne.s32.totalorder %s1165_s13, %s1161_s12  ;;  %p126_p11 = scmp.eq.s32.totalorder %s870_s21, 1 }
  0x16   : > { %p1281_p12 = por %p120_p9, %p119_p8  ;;  %p921_p1 = scmp.lt.s32.totalorder %s1189_s19, 2 }
  0x17   : > { %p1286_p0 = por %p126_p11, %p125_p10  ;;  %s1191_s4 = smov [#allocation2]  }
  0x18   : > { %s2161_s28 = scalar_select %p1281_p12, 1, 0 }
  0x19   : > { %s2162_s29 = scalar_select %p1286_p0, 1, 0 }
  0x1a   : > { %p1293_p2 = pnand %p921_p1, %p1263_p4  ;;  %s187_s5 = sshll.u32 %s1191_s4, 4  ;;  %s188_s5 = int_to_ptr.vmem [resolvable:$true] %s187_s5 }
  0x1b   : > { %s998_s8 = scalar_lea.hbm %s2115_s0, 5120 }
  0x1c   : > { %p999_p3 = scmp.ne.s32.totalorder %s2115_s0, %s998_s8  ;;  %p1000_p5 = pneg %p1293_p2 }
  0x1d   : > { %p1005_p8 = scmp.lt.s32.totalorder %s998_s8, %s998_s8 }
  0x1e   : > { %p1001_p4 = pnand %p1000_p5, %p999_p3 }
  0x20   : > { %p1002_p7 = pneg %p1001_p4 }
  0x22   : > { %p1007_p9 = pnand %p1005_p8, %p1002_p7 }
  0x24   : > { %1010 = shalt.err (!%p1007_p9)
}
  0x25   : > { %s1011_s11 = scalar_lea.vmem %s188_s5, 5120  ;;  %s1018_s15 = scalar_lea.vmem %s188_s5, 10240 }
  0x26   : > { %p1012_p10 = scmp.ne.s32.totalorder %s188_s5, %s1011_s11  ;;  %p1019_p13 = scmp.lt.s32.totalorder %s188_s5, %s188_s5 }
  0x27   : > { %p1020_p0 = scmp.lt.s32.totalorder %s1018_s15, %s1011_s11 }
  0x28   : > { %p1014_p11 = pnand %p1012_p10, %p1000_p5 }
  0x29   : > { %p1021_p12 = por %p1020_p0, %p1019_p13 }
  0x2a   : > { %p1015_p1 = pneg %p1014_p11 }
  0x2c   : > { %p1022_p6 = pnand %p1021_p12, %p1015_p1 }
  0x2e   : > { %1025 = shalt.err (!%p1022_p6)
}
  0x2f   : > { %s1192_s20 = smov 512   ;;  %s1193_s21 = smov 32  }
  0x30   : > { %910 = dma.hbm_to_vmem [thread:$0]  (!%p1293_p2), %s2115_s0, 5120, %s188_s5, [#allocation3], %s1192_s20, %s1192_s20, %s1193_s21  }
  0x31   : > { %p877_p3 = scmp.ge.s32.totalorder %s1189_s19, 1  ;;  %p220_p4 = scmp.lt.s32.totalorder %s1189_s19, 3 }
  0x32   : > { %s1194_s4 = smov [#allocation5]   ;;  %s1026_s9 = scalar_lea.hbm %s2116_s1, 5120 }
  0x33   : > { %p1318_p7 = pnand %p877_p3, %p220_p4  ;;  %s212_s6 = sshll.u32 %s1194_s4, 4  ;;  %s213_s6 = int_to_ptr.vmem [resolvable:$true] %s212_s6 }
  0x34   : > { %p1027_p6 = scmp.ne.s32.totalorder %s2116_s1, %s1026_s9  ;;  %p1033_p0 = scmp.lt.s32.totalorder %s1026_s9, %s1026_s9 }
  0x35   : > { %s2164_s26 = scalar_select %p1318_p7, 1, 0 }
  0x36   : > { %p1029_p12 = pnand %p1027_p6, %p1000_p5 }
  0x38   : > { %p1030_p13 = pneg %p1029_p12 }
  0x3a   : > { %p1035_p8 = pnand %p1033_p0, %p1030_p13 }
  0x3c   : > { %1038 = shalt.err (!%p1035_p8)
}
  0x3d   : > { %s1039_s5 = scalar_lea.vmem %s213_s6, 5120  ;;  %s1046_s15 = scalar_lea.vmem %s213_s6, 10240 }
  0x3e   : > { %p1040_p9 = scmp.ne.s32.totalorder %s213_s6, %s1039_s5  ;;  %p1047_p1 = scmp.lt.s32.totalorder %s213_s6, %s213_s6 }
  0x3f   : > { %p1048_p3 = scmp.lt.s32.totalorder %s1046_s15, %s1039_s5 }
  0x40   : > { %p1042_p10 = pnand %p1040_p9, %p1000_p5 }
  0x41   : > { %p1049_p4 = por %p1048_p3, %p1047_p1 }
  0x42   : > { %p1043_p11 = pneg %p1042_p10 }
  0x44   : > { %p1050_p7 = pnand %p1049_p4, %p1043_p11 }
  0x46   : > { %1053 = shalt.err (!%p1050_p7)
}
  0x47   : > { %913 = dma.hbm_to_vmem [thread:$0]  (!%p1293_p2), %s2116_s1, 5120, %s213_s6, [#allocation6], %s1192_s20, %s1192_s20, %s1193_s21  }
  0x48   : > { %p2165_p6 = scmp.ne.s32.totalorder %s2164_s26, 0 }
  0x4a   : > { %224 = sbr.rel (%p2165_p6) target bundleno = 209 (0xd1), region = 28 }
  0x4f   : > { %s226_s4 = sand.u32 1, %s1177_s16   ;;  %p2166_p5 = scmp.ne.s32.totalorder %s2160_s24, 0 }
  0x50   : > { %s898_s7 = smul.u32 320, %s226_s4  ;;  %s227_s8 = scalar_lea.sflag [#allocation3], %s226_s4 }
  0x52   : > { %s1342_s9 = scalar_lea.vmem [#allocation2], %s898_s7 }
  0x53   : > { %1143 = dma.done.wait (%p2166_p5), %s227_s8, 5120  }
  0x54   : > { %1145 = vsyncadd (%p2166_p5), %s227_s8, 4294962176  ;;  %s236_s30 = scalar_lea.sflag [#allocation6], %s226_s4  ;;  %s1348_s10 = scalar_lea.vmem [#allocation5], %s898_s7 }
  0x55   : > { %1147 = dma.done.wait (%p2166_p5), %s236_s30, 5120  }
  0x56   : > { %1149 = vsyncadd (%p2166_p5), %s236_s30, 4294962176  ;;  %s493_s20 = smul.u32 80, %s1181_s17  ;;  %v494_v0 = vlaneseq  ;;  %v1370_v18 = vld [vmem:[%s1342_s9] sm:$0xff]  ;;  %v1468_v53 = vld [vmem:[%s1342_s9 + $0x8] sm:$0xff]  ;;  %s1593_s24 = sand.u32 1, %s1165_s13  }
  0x57   : > { %v1373_v19 = vld [vmem:[%s1342_s9 + $0x20] sm:$0xff]  ;;  %2171 = vst [vmem:[#allocation18_spill] sm:$0xff] %v1468_v53  ;;  %v1471_v54 = vld [vmem:[%s1342_s9 + $0x28] sm:$0xff]  ;;  %s878_s21 = sshll.u32 %s1593_s24, 5  ;;  %s892_s6 = sshll.u32 %s1181_s17, 9 }
  0x58   : > { %v495_v1 = vshrl.u32 %v494_v0, 7  ;;  %v505_v2 = vstv %s493_s20  ;;  %v1376_v20 = vld [vmem:[%s1342_s9 + $0x40] sm:$0xff]  ;;  %2172 = vst [vmem:[#allocation19_spill] sm:$0xff] %v1471_v54  ;;  %v1483_v59 = vld [vmem:[%s1342_s9 + $0x48] sm:$0xff]  ;;  %s1730_s26 = scalar_lea.vmem [#allocation7], %s878_s21  ;;  %s1897_s23 = scalar_lea.hbm %s2117_s2, %s892_s6 }
  0x59   : > { %v1382_v22 = vld [vmem:[%s1342_s9 + $0x60] sm:$0xff]  ;;  %2173 = vst [vmem:[#allocation20_spill] sm:$0xff] %v1483_v59  ;;  %v1486_v60 = vld [vmem:[%s1342_s9 + $0x68] sm:$0xff]  ;;  %s722_s11 = sshll.u32 %s1730_s26, 4  ;;  %s703_s25 = scalar_lea.sflag [#allocation4], %s1593_s24  ;;  %s1899_s11 = int_to_ptr.vmem [resolvable:$true] %s722_s11 }
  0x5a   : > { %v496_v3 = vadd.s32 8, %v495_v1  ;;  %v497_v4 = vadd.s32 16, %v495_v1  ;;  %v498_v5 = vadd.s32 24, %v495_v1  ;;  %v1355_v6 = vadd.s32 %v505_v2, %v495_v1  ;;  %v1385_v23 = vld [vmem:[%s1342_s9 + $0x80] sm:$0xff]  ;;  %2174 = vst [vmem:[#allocation21_spill] sm:$0xff] %v1486_v60  ;;  %v1489_v61 = vld [vmem:[%s1342_s9 + $0x88] sm:$0xff] }
  0x5b   : > { %v499_v7 = vadd.s32 32, %v495_v1  ;;  %v500_v8 = vadd.s32 40, %v495_v1  ;;  %v501_v10 = vadd.s32 48, %v495_v1  ;;  %v502_v12 = vadd.s32 56, %v495_v1  ;;  %v1388_v24 = vld [vmem:[%s1348_s10] sm:$0xff]  ;;  %2175 = vst [vmem:[#allocation22_spill] sm:$0xff] %v1489_v61 }
  0x5c   : > { %v1357_v9 = vadd.s32 %v505_v2, %v496_v3  ;;  %v1359_v11 = vadd.s32 %v505_v2, %v497_v4  ;;  %v503_v13 = vadd.s32 64, %v495_v1  ;;  %v504_v14 = vadd.s32 72, %v495_v1  ;;  %v1391_v25 = vld [vmem:[%s1348_s10 + $0x20] sm:$0xff]  ;;  %v1494_v0 = vld [vmem:[%s1342_s9 + $0xa8] sm:$0xff]  ;;  %s1054_s4 = scalar_lea.vmem %s1899_s11, 512  ;;  %p2247_p7 = scmp.ne.s32.totalorder %s2161_s28, 0 }
  0x5d   : > { %v1361_v15 = vadd.s32 %v505_v2, %v498_v5  ;;  %vm516_vm0 = vcmp.lt.s32.totalorder %v1355_v6, 75  ;;  %v1364_v16 = vadd.s32 %v505_v2, %v499_v7  ;;  %v1366_v17 = vadd.s32 %v505_v2, %v500_v8  ;;  %v1401_v29 = vld [vmem:[%s1342_s9 + $0xa0] sm:$0xff]  ;;  %2176 = vst [vmem:[#allocation23_spill] sm:$0xff] %v1494_v0  ;;  %v1497_v1 = vld [vmem:[%s1348_s10 + $0x8] sm:$0xff]  ;;  %p1055_p2 = scmp.ne.s32.totalorder %s1899_s11, %s1054_s4  ;;  %s1195_s7 = smov [#allocation7]  }
  0x5e   : > { %vm517_vm1 = vcmp.lt.s32.totalorder %v1357_v9, 75  ;;  %v1378_v21 = vadd.s32 %v505_v2, %v501_v10  ;;  %vm518_vm2 = vcmp.lt.s32.totalorder %v1359_v11, 75  ;;  %v1393_v26 = vadd.s32 %v505_v2, %v502_v12  ;;  %v1404_v30 = vld [vmem:[%s1342_s9 + $0xc0] sm:$0xff]  ;;  %2177 = vst [vmem:[#allocation24_spill] sm:$0xff] %v1497_v1  ;;  %v1520_v12 = vld [vmem:[%s1348_s10 + $0x48] sm:$0xff]  ;;  %v1686_v1 = vld [vmem:[%s1342_s9 + $0x130] sm:$0xff] }
  0x5f   : > { %v1395_v27 = vadd.s32 %v505_v2, %v503_v13  ;;  %v526_v28 = vsel %vm516_vm0, %v1370_v18, 0.0  ;;  %v1407_v31 = vld [vmem:[%s1348_s10 + $0x40] sm:$0xff]  ;;  %v1409_v32 = vadd.s32 %v505_v2, %v504_v14  ;;  %vm519_vm3 = vcmp.lt.s32.totalorder %v1361_v15, 75  ;;  %v1500_v2 = vld [vmem:[%s1348_s10 + $0x28] sm:$0xff]  ;;  %2179 = vst [vmem:[#allocation26_spill] sm:$0xff] %v1520_v12  ;;  %2197 = vst [vmem:[#allocation44_spill] sm:$0xff] %v1686_v1  ;;  %p1056_p12 = pnand %p1055_p2, %p2247_p7 }
  0x60   : > { %v530_v33 = vsel %vm517_vm1, %v1373_v19, 0.0  ;;  %v1416_v34 = vld [vmem:[%s1342_s9 + $0xe0] sm:$0xff]  ;;  %vm520_vm4 = vcmp.lt.s32.totalorder %v1364_v16, 75  ;;  %vm521_vm5 = vcmp.lt.s32.totalorder %v1366_v17, 75  ;;  %v534_v37 = vsel %vm518_vm2, %v1376_v20, 0.0  ;;  %2178 = vst [vmem:[#allocation25_spill] sm:$0xff] %v1500_v2 }
  0x61   : > { %v1419_v35 = vld [vmem:[%s1348_s10 + $0x60] sm:$0xff]  ;;  %vm522_vm6 = vcmp.lt.s32.totalorder %v1378_v21, 75  ;;  %v610_v43 = vadd.f32 %v530_v33, %v526_v28  ;;  %vm523_vm7 = vcmp.lt.s32.totalorder %v1393_v26, 75  ;;  %vm524_vm8 = vcmp.lt.s32.totalorder %v1395_v27, 75  ;;  %v1523_v13 = vld [vmem:[%s1348_s10 + $0x68] sm:$0xff]  ;;  %v1705_v12 = vld [vmem:[%s1342_s9 + $0x18] sm:$0xff]  ;;  %p1057_p13 = pneg %p1056_p12 }
  0x62   : > { %v1422_v36 = vld [vmem:[%s1348_s10 + $0x80] sm:$0xff]  ;;  %v538_v48 = vsel %vm519_vm3, %v1382_v22, 0.0  ;;  %vm525_vm9 = vcmp.lt.s32.totalorder %v1409_v32, 75  ;;  %v542_v58 = vsel %vm520_vm4, %v1385_v23, 0.0  ;;  %v527_v3 = vsel %vm516_vm0, %v1468_v53, 0.0  ;;  %2180 = vst [vmem:[#allocation27_spill] sm:$0xff] %v1523_v13 }
  0x63   : > { %v1430_v38 = vld [vmem:[%s1348_s10 + $0xa0] sm:$0xff]  ;;  %v611_v52 = vadd.f32 %v610_v43, %v534_v37  ;;  %v531_v4 = vsel %vm517_vm1, %v1471_v54, 0.0  ;;  %v546_v7 = vsel %vm521_vm5, %v1401_v29, 0.0  ;;  %v550_v8 = vsel %vm522_vm6, %v1404_v30, 0.0  ;;  %v1526_v14 = vld [vmem:[%s1348_s10 + $0x88] sm:$0xff]  ;;  %2200 = vst [vmem:[#allocation47_spill] sm:$0xff] %v1705_v12 }
  0x64   : > { %v1433_v39 = vld [vmem:[%s1348_s10 + $0xc0] sm:$0xff]  ;;  %v554_v10 = vsel %vm523_vm7, %v1416_v34, 0.0  ;;  %2181 = vst [vmem:[#allocation28_spill] sm:$0xff] %v1526_v14  ;;  %v1537_v43 = vld [vmem:[%s1342_s9 + $0xc8] sm:$0xff]  ;;  %v535_v5 = vsel %vm518_vm2, %v1483_v59, 0.0  ;;  %v539_v55 = vsel %vm519_vm3, %v1486_v60, 0.0  ;;  %v619_v51 = vadd.f32 %v531_v4, %v527_v3 }
  0x65   : > { %v1436_v40 = vld [vmem:[%s1348_s10 + $0xe0] sm:$0xff]  ;;  %v612_v63 = vadd.f32 %v611_v52, %v538_v48  ;;  %2182 = vst [vmem:[#allocation29_spill] sm:$0xff] %v1537_v43  ;;  %v1540_v48 = vld [vmem:[%s1348_s10 + $0xa8] sm:$0xff]  ;;  %v1611_v3 = vld [vmem:[%s1342_s9 + $0x50] sm:$0xff]  ;;  %v529_v54 = vsel %vm516_vm0, %v1705_v12, 0.0  ;;  %v2204_v12 = vsub.f32 %v1407_v31, %v1376_v20  ;;  %s1058_s8 = sshll.u32 %s1195_s7, 4  ;;  %s1059_s8 = int_to_ptr.vmem [resolvable:$false] %s1058_s8 }
  0x66   : > { %v1444_v44 = vld [vmem:[%s1342_s9 + $0x100] sm:$0xff]  ;;  %2183 = vst [vmem:[#allocation30_spill] sm:$0xff] %v1540_v48  ;;  %v1543_v52 = vld [vmem:[%s1348_s10 + $0xc8] sm:$0xff]  ;;  %v1617_v48 = vld [vmem:[%s1342_s9 + $0x90] sm:$0xff]  ;;  %p1061_p0 = scmp.lt.s32.totalorder %s1899_s11, %s1059_s8 }
  0x67   : > { %2167 = vst [vmem:[#allocation14_spill] sm:$0xff] %v1444_v44  ;;  %v1447_v45 = vld [vmem:[%s1342_s9 + $0x120] sm:$0xff]  ;;  %v558_v28 = vsel %vm524_vm8, %v1444_v44, 0.0  ;;  %v613_v37 = vadd.f32 %v612_v63, %v542_v58  ;;  %2184 = vst [vmem:[#allocation31_spill] sm:$0xff] %v1543_v52  ;;  %v1549_v62 = vld [vmem:[%s1342_s9 + $0xe8] sm:$0xff]  ;;  %v551_v52 = vsel %vm522_vm6, %v1537_v43, 0.0 }
  0x68   : > { %2168 = vst [vmem:[#allocation15_spill] sm:$0xff] %v1447_v45  ;;  %v1450_v46 = vld [vmem:[%s1348_s10 + $0x100] sm:$0xff]  ;;  %v1534_v33 = vsel %vm525_vm9, %v1447_v45, 0.0  ;;  %2185 = vst [vmem:[#allocation32_spill] sm:$0xff] %v1549_v62  ;;  %v1552_v57 = vld [vmem:[%s1342_s9 + $0x108] sm:$0xff] }
  0x69   : > { %2169 = vst [vmem:[#allocation16_spill] sm:$0xff] %v1450_v46  ;;  %v1460_v49 = vld [vmem:[%s1348_s10 + $0x120] sm:$0xff]  ;;  %2186 = vst [vmem:[#allocation33_spill] sm:$0xff] %v1552_v57  ;;  %v1555_v56 = vld [vmem:[%s1348_s10 + $0xe8] sm:$0xff]  ;;  %v614_v50 = vadd.f32 %v613_v37, %v546_v7  ;;  %v543_v7 = vsel %vm520_vm4, %v1489_v61, 0.0  ;;  %v620_v37 = vadd.f32 %v619_v51, %v535_v5  ;;  %v555_v5 = vsel %vm523_vm7, %v1549_v62, 0.0 }
  0x6a   : > { %2170 = vst [vmem:[#allocation17_spill] sm:$0xff] %v1460_v49  ;;  %2187 = vst [vmem:[#allocation34_spill] sm:$0xff] %v1555_v56  ;;  %v1565_v47 = vld [vmem:[%s1342_s9 + $0x128] sm:$0xff]  ;;  %v1587_v58 = vld [vmem:[%s1342_s9 + $0x10] sm:$0xff] }
  0x6b   : > { %2188 = vst [vmem:[#allocation35_spill] sm:$0xff] %v1565_v47  ;;  %v1568_v42 = vld [vmem:[%s1348_s10 + $0x108] sm:$0xff]  ;;  %v1590_v45 = vld [vmem:[%s1342_s9 + $0x30] sm:$0xff]  ;;  %v615_v63 = vadd.f32 %v614_v50, %v550_v8  ;;  %v528_v4 = vsel %vm516_vm0, %v1587_v58, 0.0  ;;  %v547_v50 = vsel %vm521_vm5, %v1494_v0, 0.0  ;;  %v621_v8 = vadd.f32 %v620_v37, %v539_v55  ;;  %v1708_v44 = vld [vmem:[%s1342_s9 + $0x38] sm:$0xff] }
  0x6c   : > { %2189 = vst [vmem:[#allocation36_spill] sm:$0xff] %v1568_v42  ;;  %v1571_v41 = vld [vmem:[%s1348_s10 + $0x128] sm:$0xff]  ;;  %v532_v51 = vsel %vm517_vm1, %v1590_v45, 0.0  ;;  %v1614_v56 = vld [vmem:[%s1342_s9 + $0x70] sm:$0xff]  ;;  %v563_v42 = vsel %vm525_vm9, %v1565_v47, 0.0  ;;  %v1723_v46 = vld [vmem:[%s1342_s9 + $0x58] sm:$0xff] }
  0x6d   : > { %2190 = vst [vmem:[#allocation37_spill] sm:$0xff] %v1571_v41  ;;  %v616_v61 = vadd.f32 %v615_v63, %v554_v10  ;;  %v1626_v55 = vld [vmem:[%s1342_s9 + $0xb0] sm:$0xff]  ;;  %v536_v10 = vsel %vm518_vm2, %v1611_v3, 0.0  ;;  %v559_v63 = vsel %vm524_vm8, %v1552_v57, 0.0  ;;  %v622_v62 = vadd.f32 %v621_v8, %v543_v7  ;;  %v1794_v20 = vld [vmem:[%s1348_s10 + $0xb8] sm:$0xff] }
  0x6e   : > { %2191 = vst [vmem:[#allocation38_spill] sm:$0xff] %v1626_v55  ;;  %v1629_v37 = vld [vmem:[%s1348_s10 + $0x10] sm:$0xff]  ;;  %v628_v60 = vadd.f32 %v532_v51, %v528_v4  ;;  %v540_v7 = vsel %vm519_vm3, %v1614_v56, 0.0  ;;  %v544_v8 = vsel %vm520_vm4, %v1617_v48, 0.0 }
  0x6f   : > { %v1632_v41 = vld [vmem:[%s1348_s10 + $0x30] sm:$0xff]  ;;  %v617_v13 = vadd.f32 %v616_v61, %v558_v28  ;;  %v548_v61 = vsel %vm521_vm5, %v1626_v55, 0.0  ;;  %v623_v28 = vadd.f32 %v622_v62, %v547_v50  ;;  %v1775_v55 = vld [vmem:[%s1348_s10 + $0x98] sm:$0xff] }
  0x70   : > { %v1645_v43 = vld [vmem:[%s1348_s10 + $0x50] sm:$0xff]  ;;  %v629_v2 = vadd.f32 %v628_v60, %v536_v10 }
  0x71   : > { %v1648_v0 = vld [vmem:[%s1348_s10 + $0x70] sm:$0xff]  ;;  %v618_v53 = vadd.f32 %v617_v13, %v1534_v33  ;;  %v624_v60 = vadd.f32 %v623_v28, %v551_v52  ;;  %v533_v52 = vsel %vm517_vm1, %v1708_v44, 0.0  ;;  %v1726_v13 = vld [vmem:[%s1348_s10 + $0x18] sm:$0xff] }
  0x72   : > { %v1651_v14 = vld [vmem:[%s1348_s10 + $0x90] sm:$0xff]  ;;  %v630_v10 = vadd.f32 %v629_v2, %v540_v7  ;;  %2201 = vst [vmem:[#allocation48_spill] sm:$0xff] %v1726_v13  ;;  %v420_v13 = vmin.f32 %v2204_v12, 0.0 }
  0x73   : > { %v1654_v49 = vld [vmem:[%s1342_s9 + $0xd0] sm:$0xff]  ;;  %v625_v28 = vadd.f32 %v624_v60, %v555_v5  ;;  %650 = vst [vmem:[%s1730_s26] sm:$0xff] %v618_v53  ;;  %v564_v53 = vsel %vm525_vm9, %v1686_v1, 0.0 }
  0x74   : > { %2192 = vst [vmem:[#allocation39_spill] sm:$0xff] %v1654_v49  ;;  %v1657_v57 = vld [vmem:[%s1348_s10 + $0xb0] sm:$0xff]  ;;  %v631_v33 = vadd.f32 %v630_v10, %v544_v8  ;;  %v552_v5 = vsel %vm522_vm6, %v1654_v49, 0.0  ;;  %v537_v10 = vsel %vm518_vm2, %v1723_v46, 0.0 }
  0x75   : > { %v1660_v59 = vld [vmem:[%s1348_s10 + $0xd0] sm:$0xff]  ;;  %v626_v7 = vadd.f32 %v625_v28, %v559_v63  ;;  %v2203_v28 = vsub.f32 %v1391_v25, %v1373_v19  ;;  %v2205_v25 = vsub.f32 %v1419_v35, %v1382_v22 }
  0x76   : > { %2193 = vst [vmem:[#allocation40_spill] sm:$0xff] %v1660_v59  ;;  %v1672_v4 = vld [vmem:[%s1342_s9 + $0xf0] sm:$0xff]  ;;  %v632_v2 = vadd.f32 %v631_v33, %v548_v61  ;;  %v2202_v61 = vsub.f32 %v1388_v24, %v1370_v18  ;;  %v1772_v59 = vld [vmem:[%s1342_s9 + $0x98] sm:$0xff]  ;;  %v2216_v18 = vld [vmem:[#allocation18_spill] sm:$0xff] }
  0x77   : > { %2194 = vst [vmem:[#allocation41_spill] sm:$0xff] %v1672_v4  ;;  %v1675_v51 = vld [vmem:[%s1342_s9 + $0x110] sm:$0xff]  ;;  %v556_v60 = vsel %vm523_vm7, %v1672_v4, 0.0  ;;  %v1755_v4 = vld [vmem:[%s1348_s10 + $0x58] sm:$0xff]  ;;  %v416_v1 = vmin.f32 %v2203_v28, 0.0  ;;  %v545_v24 = vsel %vm520_vm4, %v1772_v59, 0.0  ;;  %v2207_v28 = vsub.f32 %v1422_v36, %v1385_v23 }
  0x78   : > { %2195 = vst [vmem:[#allocation42_spill] sm:$0xff] %v1675_v51  ;;  %v1678_v47 = vld [vmem:[%s1348_s10 + $0xf0] sm:$0xff]  ;;  %v560_v8 = vsel %vm524_vm8, %v1675_v51, 0.0  ;;  %v1758_v51 = vld [vmem:[%s1348_s10 + $0x78] sm:$0xff]  ;;  %v412_v33 = vmin.f32 %v2202_v61, 0.0 }
  0x79   : > { %2196 = vst [vmem:[#allocation43_spill] sm:$0xff] %v1678_v47  ;;  %v1689_v62 = vld [vmem:[%s1348_s10 + $0x110] sm:$0xff]  ;;  %v637_v47 = vadd.f32 %v533_v52, %v529_v54  ;;  %v627_v54 = vadd.f32 %v626_v7, %v563_v42  ;;  %v633_v52 = vadd.f32 %v632_v2, %v552_v5  ;;  %v424_v42 = vmin.f32 %v2205_v25, 0.0  ;;  %v1791_v2 = vld [vmem:[%s1342_s9 + $0xb8] sm:$0xff] }
  0x7a   : > { %2198 = vst [vmem:[#allocation45_spill] sm:$0xff] %v1689_v62  ;;  %v1692_v50 = vld [vmem:[%s1348_s10 + $0x130] sm:$0xff]  ;;  %v1752_v62 = vld [vmem:[%s1348_s10 + $0x38] sm:$0xff]  ;;  %2206 = vst [vmem:[#allocation49_spill] sm:$0xff] %v1791_v2  ;;  %v549_v5 = vsel %vm521_vm5, %v1791_v2, 0.0  ;;  %v452_v22 = vmul.f32 %v412_v33, %v412_v33  ;;  %v456_v35 = vmul.f32 %v416_v1, %v416_v1  ;;  %v2208_v1 = vsub.f32 %v1430_v38, %v1401_v29 }
  0x7b   : > { %2199 = vst [vmem:[#allocation46_spill] sm:$0xff] %v1692_v50  ;;  %v1749_v50 = vld [vmem:[%s1342_s9 + $0x78] sm:$0xff]  ;;  %v638_v49 = vadd.f32 %v637_v47, %v537_v10  ;;  %v634_v47 = vadd.f32 %v633_v52, %v556_v60  ;;  %651 = vst [vmem:[%s1730_s26 + $0x8] sm:$0xff] %v627_v54  ;;  %v2215_v19 = vld [vmem:[#allocation24_spill] sm:$0xff] }
  0x7c   : > { %v541_v63 = vsel %vm519_vm3, %v1749_v50, 0.0  ;;  %v1805_v10 = vld [vmem:[%s1342_s9 + $0xd8] sm:$0xff]  ;;  %v432_v33 = vmin.f32 %v2208_v1, 0.0  ;;  %v566_v36 = vsel %vm516_vm0, %v452_v22, 0.0 }
  0x7d   : > { %v639_v12 = vadd.f32 %v638_v49, %v541_v63  ;;  %v635_v60 = vadd.f32 %v634_v47, %v560_v8  ;;  %v428_v49 = vmin.f32 %v2207_v28, 0.0  ;;  %v460_v63 = vmul.f32 %v420_v13, %v420_v13  ;;  %v1819_v47 = vld [vmem:[%s1342_s9 + $0xf8] sm:$0xff]  ;;  %v2213_v28 = vld [vmem:[#allocation14_spill] sm:$0xff] }
  0x7e   : > { %v553_v25 = vsel %vm522_vm6, %v1805_v10, 0.0  ;;  %v464_v8 = vmul.f32 %v424_v42, %v424_v42  ;;  %v570_v13 = vsel %vm517_vm1, %v456_v35, 0.0  ;;  %v557_v29 = vsel %vm523_vm7, %v1819_v47, 0.0 }
  0x7f   : > { %v640_v61 = vadd.f32 %v639_v12, %v545_v24  ;;  %v636_v54 = vadd.f32 %v635_v60, %v564_v53  ;;  %v1822_v24 = vld [vmem:[%s1342_s9 + $0x118] sm:$0xff]  ;;  %v2210_v53 = vsub.f32 %v1433_v39, %v1404_v30  ;;  %v2211_v12 = vsub.f32 %v1436_v40, %v1416_v34 }
  0x80   : > { %2209 = vst [vmem:[#allocation50_spill] sm:$0xff] %v1822_v24  ;;  %v561_v38 = vsel %vm524_vm8, %v1822_v24, 0.0  ;;  %v468_v60 = vmul.f32 %v428_v49, %v428_v49  ;;  %v574_v35 = vsel %vm518_vm2, %v460_v63, 0.0  ;;  %v472_v7 = vmul.f32 %v432_v33, %v432_v33  ;;  %v2219_v49 = vld [vmem:[#allocation25_spill] sm:$0xff] }
  0x81   : > { %v641_v23 = vadd.f32 %v640_v61, %v549_v5  ;;  %v436_v42 = vmin.f32 %v2210_v53, 0.0  ;;  %v440_v5 = vmin.f32 %v2211_v12, 0.0  ;;  %v2212_v61 = vld [vmem:[#allocation16_spill] sm:$0xff]  ;;  %v658_v31 = vadd.f32 %v570_v13, %v566_v36  ;;  %652 = vst [vmem:[%s1730_s26 + $0x10] sm:$0xff] %v636_v54  ;;  %v1850_v53 = vld [vmem:[%s1342_s9 + $0x138] sm:$0xff]  ;;  %v2222_v12 = vld [vmem:[#allocation26_spill] sm:$0xff] }
  0x82   : > { %v2214_v1 = vsub.f32 %v2212_v61, %v2213_v28  ;;  %v2217_v30 = vsub.f32 %v2215_v19, %v2216_v18  ;;  %2218 = vst [vmem:[#allocation16_spill] sm:$0xff] %v1850_v53  ;;  %v578_v40 = vsel %vm519_vm3, %v464_v8, 0.0  ;;  %v2223_v61 = vld [vmem:[#allocation20_spill] sm:$0xff]  ;;  %v565_v18 = vsel %vm525_vm9, %v1850_v53, 0.0  ;;  %v2225_v19 = vld [vmem:[#allocation17_spill] sm:$0xff]  ;;  %v2226_v54 = vld [vmem:[#allocation15_spill] sm:$0xff] }
  0x83   : > { %v642_v22 = vadd.f32 %v641_v23, %v553_v25  ;;  %v2220_v25 = vld [vmem:[#allocation19_spill] sm:$0xff]  ;;  %v2224_v33 = vsub.f32 %v2222_v12, %v2223_v61  ;;  %v2227_v13 = vsub.f32 %v2225_v19, %v2226_v54  ;;  %v659_v8 = vadd.f32 %v658_v31, %v574_v35  ;;  %v1867_v28 = vld [vmem:[%s1348_s10 + $0xd8] sm:$0xff]  ;;  %s1060_s9 = scalar_lea.vmem %s1059_s8, 1024 }
  0x84   : > { %v444_v52 = vmin.f32 %v2214_v1, 0.0  ;;  %v413_v39 = vmin.f32 %v2217_v30, 0.0  ;;  %v2221_v63 = vsub.f32 %v2219_v49, %v2220_v25  ;;  %v480_v30 = vmul.f32 %v440_v5, %v440_v5  ;;  %v2228_v25 = vld [vmem:[#allocation27_spill] sm:$0xff]  ;;  %v2232_v5 = vld [vmem:[#allocation22_spill] sm:$0xff]  ;;  %p1062_p8 = scmp.lt.s32.totalorder %s1060_s9, %s1054_s4 }
  0x85   : > { %v643_v34 = vadd.f32 %v642_v22, %v557_v29  ;;  %v421_v36 = vmin.f32 %v2224_v33, 0.0  ;;  %v448_v29 = vmin.f32 %v2227_v13, 0.0  ;;  %v476_v22 = vmul.f32 %v436_v42, %v436_v42 }
  0x86   : > { %v417_v23 = vmin.f32 %v2221_v63, 0.0  ;;  %v582_v49 = vsel %vm520_vm4, %v468_v60, 0.0  ;;  %v2229_v63 = vld [vmem:[#allocation21_spill] sm:$0xff]  ;;  %v484_v33 = vmul.f32 %v444_v52, %v444_v52  ;;  %v660_v24 = vadd.f32 %v659_v8, %v578_v40  ;;  %v2234_v40 = vld [vmem:[#allocation30_spill] sm:$0xff]  ;;  %p1063_p9 = por %p1062_p8, %p1061_p0 }
  0x87   : > { %v644_v1 = vadd.f32 %v643_v34, %v561_v38  ;;  %v2230_v12 = vsub.f32 %v2228_v25, %v2229_v63  ;;  %v453_v53 = vmul.f32 %v413_v39, %v413_v39  ;;  %v586_v31 = vsel %vm521_vm5, %v472_v7, 0.0  ;;  %v2231_v38 = vld [vmem:[#allocation28_spill] sm:$0xff]  ;;  %v2240_v63 = vld [vmem:[#allocation34_spill] sm:$0xff] }
  0x88   : > { %v457_v2 = vmul.f32 %v417_v23, %v417_v23  ;;  %v2233_v35 = vsub.f32 %v2231_v38, %v2232_v5  ;;  %v461_v34 = vmul.f32 %v421_v36, %v421_v36  ;;  %v399_v19 = vsub.f32 %v1867_v28, %v1805_v10  ;;  %v2235_v23 = vld [vmem:[#allocation23_spill] sm:$0xff]  ;;  %p1064_p10 = pnand %p1063_p9, %p1057_p13 }
  0x89   : > { %v425_v61 = vmin.f32 %v2230_v12, 0.0  ;;  %v645_v42 = vadd.f32 %v644_v1, %v565_v18  ;;  %v590_v52 = vsel %vm522_vm6, %v476_v22, 0.0  ;;  %v661_v39 = vadd.f32 %v660_v24, %v582_v49  ;;  %v2237_v22 = vld [vmem:[#allocation31_spill] sm:$0xff]  ;;  %v2238_v1 = vld [vmem:[#allocation29_spill] sm:$0xff]  ;;  %v2241_v12 = vld [vmem:[#allocation32_spill] sm:$0xff] }
  0x8a   : > { %v429_v60 = vmin.f32 %v2233_v35, 0.0  ;;  %v2236_v54 = vsub.f32 %v2234_v40, %v2235_v23  ;;  %v567_v7 = vsel %vm516_vm0, %v453_v53, 0.0  ;;  %v571_v8 = vsel %vm517_vm1, %v457_v2, 0.0 }
  0x8b   : > { %v465_v13 = vmul.f32 %v425_v61, %v425_v61  ;;  %v488_v24 = vmul.f32 %v448_v29, %v448_v29  ;;  %v594_v36 = vsel %vm523_vm7, %v480_v30, 0.0  ;;  %v662_v53 = vadd.f32 %v661_v39, %v586_v31  ;;  %653 = vst [vmem:[%s1730_s26 + $0x18] sm:$0xff] %v645_v42  ;;  %v2243_v30 = vld [vmem:[#allocation36_spill] sm:$0xff]  ;;  %v2244_v31 = vld [vmem:[#allocation33_spill] sm:$0xff] }
  0x8c   : > { %v433_v18 = vmin.f32 %v2236_v54, 0.0  ;;  %v2239_v2 = vsub.f32 %v2237_v22, %v2238_v1  ;;  %v598_v25 = vsel %vm524_vm8, %v484_v33, 0.0  ;;  %v2242_v61 = vsub.f32 %v2240_v63, %v2241_v12 }
  0x8d   : > { %v469_v5 = vmul.f32 %v429_v60, %v429_v60  ;;  %v575_v29 = vsel %vm518_vm2, %v461_v34, 0.0  ;;  %v663_v35 = vadd.f32 %v662_v53, %v590_v52  ;;  %v2245_v39 = vsub.f32 %v2243_v30, %v2244_v31 }
  0x8e   : > { %v437_v49 = vmin.f32 %v2239_v2, 0.0  ;;  %v441_v38 = vmin.f32 %v2242_v61, 0.0  ;;  %v667_v23 = vadd.f32 %v571_v8, %v567_v7  ;;  %v2246_v42 = vsub.f32 %v1629_v37, %v1587_v58 }
  0x8f   : > { %v445_v40 = vmin.f32 %v2245_v39, 0.0 }
  0x90   : > { %v414_v54 = vmin.f32 %v2246_v42, 0.0 }
  0x91   : > { %1067 = shalt.err (!%p1064_p10)
}
  0x92   : > { %s1068_s30 = scalar_lea.hbm %s1897_s23, 512  ;;  %s1072_s5 = scalar_lea.hbm %s2117_s2, 1024 }
  0x93   : > { %p1069_p11 = scmp.ne.s32.totalorder %s1897_s23, %s1068_s30  ;;  %p1073_p4 = scmp.lt.s32.totalorder %s1897_s23, %s2117_s2 }
  0x94   : > { %p1074_p6 = scmp.lt.s32.totalorder %s1072_s5, %s1068_s30 }
  0x95   : > { %p1070_p1 = pnand %p1069_p11, %p2247_p7 }
  0x96   : > { %p1075_p5 = por %p1074_p6, %p1073_p4 }
  0x97   : > { %p1071_p3 = pneg %p1070_p1 }
  0x99   : > { %p1076_p2 = pnand %p1075_p5, %p1071_p3 }
  0x9b   : > { %1079 = shalt.err (!%p1076_p2)
}
  0x9c   : > { %903 = dma.vmem_to_hbm [thread:$0]  (%p2247_p7), %s1899_s11, 512, %s1897_s23, %s703_s25   ;;  %v473_v58 = vmul.f32 %v433_v18, %v433_v18  ;;  %v579_v37 = vsel %vm519_vm3, %v465_v13, 0.0  ;;  %v2248_v33 = vsub.f32 %v1632_v41, %v1590_v45  ;;  %v2249_v34 = vsub.f32 %v1645_v43, %v1611_v3  ;;  %v1952_v1 = vld [vmem:[%s1348_s10 + $0xf8] sm:$0xff]  ;;  %v2251_v2 = vld [vmem:[#allocation35_spill] sm:$0xff]  ;;  %v2279_v6 = vld [vmem:[#allocation16_spill] sm:$0xff] }
  0x9d   : > { %v602_v7 = vsel %vm525_vm9, %v488_v24, 0.0  ;;  %v664_v8 = vadd.f32 %v663_v35, %v594_v36  ;;  %v477_v53 = vmul.f32 %v437_v49, %v437_v49  ;;  %v668_v22 = vadd.f32 %v667_v23, %v575_v29  ;;  %v2250_v18 = vld [vmem:[#allocation37_spill] sm:$0xff]  ;;  %s1989_s11 = scalar_lea.vmem [#allocation8], %s878_s21  ;;  %s734_s25 = scalar_lea.hbm %s2118_s3, %s892_s6 }
  0x9e   : > { %v418_v60 = vmin.f32 %v2248_v33, 0.0  ;;  %v422_v52 = vmin.f32 %v2249_v34, 0.0  ;;  %v2252_v63 = vsub.f32 %v2250_v18, %v2251_v2  ;;  %v583_v41 = vsel %vm520_vm4, %v469_v5, 0.0  ;;  %s708_s4 = scalar_lea.sflag [#allocation9], %s1593_s24  ;;  %s1196_s9 = smov [#allocation8]  }
  0x9f   : > { %v2253_v45 = vsub.f32 %v1648_v0, %v1614_v56  ;;  %v454_v3 = vmul.f32 %v414_v54, %v414_v54  ;;  %v665_v12 = vadd.f32 %v664_v8, %v598_v25  ;;  %v481_v61 = vmul.f32 %v441_v38, %v441_v38  ;;  %v2255_v38 = vld [vmem:[#allocation38_spill] sm:$0xff]  ;;  %s1084_s30 = sshll.u32 %s1196_s9, 4  ;;  %s1085_s30 = int_to_ptr.vmem [resolvable:$false] %s1084_s30 }
  0xa0   : > { %v449_v13 = vmin.f32 %v2252_v63, 0.0  ;;  %v669_v24 = vadd.f32 %v668_v22, %v579_v37  ;;  %v458_v36 = vmul.f32 %v418_v60, %v418_v60  ;;  %v485_v49 = vmul.f32 %v445_v40, %v445_v40  ;;  %v2258_v37 = vld [vmem:[#allocation39_spill] sm:$0xff]  ;;  %v2261_v22 = vld [vmem:[#allocation41_spill] sm:$0xff]  ;;  %s1086_s20 = scalar_lea.vmem %s1085_s30, 1024 }
  0xa1   : > { %v426_v43 = vmin.f32 %v2253_v45, 0.0  ;;  %v587_v29 = vsel %vm521_vm5, %v473_v58, 0.0  ;;  %v2254_v35 = vsub.f32 %v1651_v14, %v1617_v48  ;;  %v462_v31 = vmul.f32 %v422_v52, %v422_v52  ;;  %v2257_v58 = vld [vmem:[#allocation40_spill] sm:$0xff] }
  0xa2   : > { %v403_v5 = vsub.f32 %v1952_v1, %v1819_v47  ;;  %v666_v56 = vadd.f32 %v665_v12, %v602_v7  ;;  %v591_v0 = vsel %vm522_vm6, %v477_v53, 0.0  ;;  %v670_v25 = vadd.f32 %v669_v24, %v583_v41  ;;  %v2260_v53 = vld [vmem:[#allocation43_spill] sm:$0xff] }
  0xa3   : > { %v430_v30 = vmin.f32 %v2254_v35, 0.0  ;;  %v2256_v39 = vsub.f32 %v1657_v57, %v2255_v38  ;;  %v466_v23 = vmul.f32 %v426_v43, %v426_v43  ;;  %v568_v42 = vsel %vm516_vm0, %v454_v3, 0.0  ;;  %v2264_v41 = vld [vmem:[#allocation47_spill] sm:$0xff]  ;;  %v2268_v35 = vld [vmem:[#allocation45_spill] sm:$0xff] }
  0xa4   : > { %v572_v14 = vsel %vm517_vm1, %v458_v36, 0.0  ;;  %v489_v48 = vmul.f32 %v449_v13, %v449_v13  ;;  %v671_v54 = vadd.f32 %v670_v25, %v587_v29  ;;  %v2259_v33 = vsub.f32 %v2257_v58, %v2258_v37  ;;  %698 = vst [vmem:[%s1989_s11] sm:$0xff] %v666_v56  ;;  %v2263_v13 = vld [vmem:[#allocation48_spill] sm:$0xff]  ;;  %v367_v37 = vld [vmem:[%s1348_s10 + $0x118] sm:$0xff] }
  0xa5   : > { %v434_v40 = vmin.f32 %v2256_v39, 0.0  ;;  %v595_v34 = vsel %vm523_vm7, %v481_v61, 0.0  ;;  %v599_v57 = vsel %vm524_vm8, %v485_v49, 0.0  ;;  %v470_v52 = vmul.f32 %v430_v30, %v430_v30  ;;  %v2269_v30 = vld [vmem:[#allocation42_spill] sm:$0xff] }
  0xa6   : > { %v438_v60 = vmin.f32 %v2259_v33, 0.0  ;;  %v576_v7 = vsel %vm518_vm2, %v462_v31, 0.0  ;;  %v672_v8 = vadd.f32 %v671_v54, %v591_v0  ;;  %v2262_v18 = vsub.f32 %v2260_v53, %v2261_v22  ;;  %v2276_v53 = vld [vmem:[#allocation49_spill] sm:$0xff] }
  0xa7   : > { %v676_v63 = vadd.f32 %v572_v14, %v568_v42  ;;  %v2265_v45 = vsub.f32 %v2263_v13, %v2264_v41  ;;  %v474_v3 = vmul.f32 %v434_v40, %v434_v40  ;;  %v580_v12 = vsel %vm519_vm3, %v466_v23, 0.0  ;;  %v2272_v40 = vld [vmem:[#allocation46_spill] sm:$0xff]  ;;  %v2273_v23 = vld [vmem:[#allocation44_spill] sm:$0xff] }
  0xa8   : > { %v442_v2 = vmin.f32 %v2262_v18, 0.0  ;;  %v2266_v61 = vsub.f32 %v1752_v62, %v1708_v44  ;;  %v2267_v36 = vsub.f32 %v1755_v4, %v1723_v46  ;;  %v673_v29 = vadd.f32 %v672_v8, %v595_v34  ;;  %v371_v8 = vld [vmem:[%s1348_s10 + $0x138] sm:$0xff]  ;;  %s736_s10 = sshll.u32 %s1989_s11, 4  ;;  %s737_s10 = int_to_ptr.vmem [resolvable:$true] %s736_s10 }
  0xa9   : > { %v415_v43 = vmin.f32 %v2265_v45, 0.0  ;;  %v2270_v31 = vsub.f32 %v2268_v35, %v2269_v30  ;;  %v478_v0 = vmul.f32 %v438_v60, %v438_v60  ;;  %v677_v25 = vadd.f32 %v676_v63, %v576_v7  ;;  %s1080_s8 = scalar_lea.vmem %s737_s10, 512  ;;  %p1087_p8 = scmp.lt.s32.totalorder %s737_s10, %s1085_s30 }
  0xaa   : > { %v419_v24 = vmin.f32 %v2266_v61, 0.0  ;;  %v423_v49 = vmin.f32 %v2267_v36, 0.0  ;;  %v603_v38 = vsel %vm525_vm9, %v489_v48, 0.0  ;;  %v584_v39 = vsel %vm520_vm4, %v470_v52, 0.0  ;;  %p1081_p12 = scmp.ne.s32.totalorder %s737_s10, %s1080_s8  ;;  %p1088_p9 = scmp.lt.s32.totalorder %s1086_s20, %s1080_s8 }
  0xab   : > { %v446_v56 = vmin.f32 %v2270_v31, 0.0  ;;  %v2271_v44 = vsub.f32 %v1758_v51, %v1749_v50  ;;  %v455_v46 = vmul.f32 %v415_v43, %v415_v43  ;;  %v674_v4 = vadd.f32 %v673_v29, %v599_v57 }
  0xac   : > { %v2274_v42 = vsub.f32 %v2272_v40, %v2273_v23  ;;  %v678_v54 = vadd.f32 %v677_v25, %v580_v12  ;;  %v459_v58 = vmul.f32 %v419_v24, %v419_v24  ;;  %v482_v33 = vmul.f32 %v442_v2, %v442_v2  ;;  %p1082_p13 = pnand %p1081_p12, %p2247_p7  ;;  %p1089_p10 = por %p1088_p9, %p1087_p8 }
  0xad   : > { %v427_v62 = vmin.f32 %v2271_v44, 0.0  ;;  %v588_v48 = vsel %vm521_vm5, %v474_v3, 0.0  ;;  %v2275_v60 = vsub.f32 %v1775_v55, %v1772_v59  ;;  %v463_v51 = vmul.f32 %v423_v49, %v423_v49  ;;  %v2278_v55 = vld [vmem:[#allocation50_spill] sm:$0xff] }
  0xae   : > { %v450_v14 = vmin.f32 %v2274_v42, 0.0  ;;  %v675_v50 = vadd.f32 %v674_v4, %v603_v38  ;;  %v486_v52 = vmul.f32 %v446_v56, %v446_v56  ;;  %v592_v57 = vsel %vm522_vm6, %v478_v0, 0.0  ;;  %p1083_p0 = pneg %p1082_p13 }
  0xaf   : > { %v431_v34 = vmin.f32 %v2275_v60, 0.0  ;;  %v679_v7 = vadd.f32 %v678_v54, %v584_v39  ;;  %v2277_v22 = vsub.f32 %v1794_v20, %v2276_v53  ;;  %v467_v2 = vmul.f32 %v427_v62, %v427_v62 }
  0xb0   : > { %v569_v63 = vsel %vm516_vm0, %v455_v46, 0.0  ;;  %v573_v59 = vsel %vm517_vm1, %v459_v58, 0.0  ;;  %v407_v13 = vsub.f32 %v367_v37, %v2278_v55  ;;  %v490_v41 = vmul.f32 %v450_v14, %v450_v14  ;;  %699 = vst [vmem:[%s1989_s11 + $0x8] sm:$0xff] %v675_v50  ;;  %p1090_p11 = pnand %p1089_p10, %p1083_p0 }
  0xb1   : > { %v435_v18 = vmin.f32 %v2277_v22, 0.0  ;;  %v680_v45 = vadd.f32 %v679_v7, %v588_v48  ;;  %v596_v43 = vsel %vm523_vm7, %v482_v33, 0.0  ;;  %v439_v3 = vmin.f32 %v399_v19, 0.0 }
  0xb2   : > { %v471_v20 = vmul.f32 %v431_v34, %v431_v34  ;;  %v577_v12 = vsel %vm518_vm2, %v463_v51, 0.0  ;;  %v411_v61 = vsub.f32 %v371_v8, %v2279_v6  ;;  %v685_v24 = vadd.f32 %v573_v59, %v569_v63 }
  0xb3   : > { %v681_v9 = vadd.f32 %v680_v45, %v592_v57  ;;  %v600_v36 = vsel %vm524_vm8, %v486_v52, 0.0  ;;  %v443_v49 = vmin.f32 %v403_v5, 0.0  ;;  %v475_v29 = vmul.f32 %v435_v18, %v435_v18 }
  0xb4   : > { %v581_v10 = vsel %vm519_vm3, %v467_v2, 0.0  ;;  %v686_v19 = vadd.f32 %v685_v24, %v577_v12  ;;  %v604_v11 = vsel %vm525_vm9, %v490_v41, 0.0  ;;  %v447_v35 = vmin.f32 %v407_v13, 0.0 }
  0xb5   : > { %v682_v28 = vadd.f32 %v681_v9, %v596_v43  ;;  %v479_v30 = vmul.f32 %v439_v3, %v439_v3  ;;  %v585_v31 = vsel %vm520_vm4, %v471_v20, 0.0  ;;  %v451_v25 = vmin.f32 %v411_v61, 0.0 }
  0xb6   : > { %v687_v0 = vadd.f32 %v686_v19, %v581_v10  ;;  %v483_v47 = vmul.f32 %v443_v49, %v443_v49  ;;  %v589_v15 = vsel %vm521_vm5, %v475_v29, 0.0  ;;  %v487_v38 = vmul.f32 %v447_v35, %v447_v35 }
  0xb7   : > { %v683_v56 = vadd.f32 %v682_v28, %v600_v36  ;;  %v593_v39 = vsel %vm522_vm6, %v479_v30, 0.0  ;;  %v491_v16 = vmul.f32 %v451_v25, %v451_v25 }
  0xb8   : > { %v688_v5 = vadd.f32 %v687_v0, %v585_v31  ;;  %v597_v62 = vsel %vm523_vm7, %v483_v47, 0.0  ;;  %v601_v17 = vsel %vm524_vm8, %v487_v38, 0.0 }
  0xb9   : > { %v684_v1 = vadd.f32 %v683_v56, %v604_v11  ;;  %v605_v40 = vsel %vm525_vm9, %v491_v16, 0.0 }
  0xba   : > { %v689_v44 = vadd.f32 %v688_v5, %v589_v15 }
  0xbb   : > { %700 = vst [vmem:[%s1989_s11 + $0x10] sm:$0xff] %v684_v1 }
  0xbc   : > { %v690_v46 = vadd.f32 %v689_v44, %v593_v39 }
  0xbe   : > { %v691_v4 = vadd.f32 %v690_v46, %v597_v62 }
  0xc0   : > { %v692_v23 = vadd.f32 %v691_v4, %v601_v17 }
  0xc2   : > { %v693_v21 = vadd.f32 %v692_v23, %v605_v40 }
  0xc4   : > { %701 = vst [vmem:[%s1989_s11 + $0x18] sm:$0xff] %v693_v21 }
  0xc5   : > { %1093 = shalt.err (!%p1090_p11)
}
  0xc6   : > { %s1094_s17 = scalar_lea.hbm %s734_s25, 512  ;;  %s1098_s26 = scalar_lea.hbm %s2118_s3, 1024 }
  0xc7   : > { %p1095_p1 = scmp.ne.s32.totalorder %s734_s25, %s1094_s17  ;;  %p1099_p6 = scmp.lt.s32.totalorder %s734_s25, %s2118_s3 }
  0xc8   : > { %p1100_p5 = scmp.lt.s32.totalorder %s1098_s26, %s1094_s17 }
  0xc9   : > { %p1096_p3 = pnand %p1095_p1, %p2247_p7 }
  0xca   : > { %p1101_p2 = por %p1100_p5, %p1099_p6 }
  0xcb   : > { %p1097_p4 = pneg %p1096_p3 }
  0xcd   : > { %p1102_p12 = pnand %p1101_p2, %p1097_p4 }
  0xcf   : > { %1105 = shalt.err (!%p1102_p12)
}
  0xd0   : > { %904 = dma.vmem_to_hbm [thread:$0]  (%p2247_p7), %s737_s10, 512, %s734_s25, %s708_s4  }
  0xd1 PF: > { %s748_s7 = sand.u32 1, %s1161_s12   ;;  %p2280_p13 = scmp.ne.s32.totalorder %s2162_s29, 0 }
  0xd2   : > { %p2281_p0 = scmp.ge.s32.totalorder %s1189_s19, 2  ;;  %s749_s11 = scalar_lea.sflag [#allocation4], %s748_s7 }
  0xd4   : > { %p915_p8 = pnand %p2281_p0, %p2280_p13 }
  0xd6   : > { %p916_p9 = pneg %p915_p8 }
  0xd8   : > { %1151 = dma.done.wait (%p916_p9), %s749_s11, 512  }
  0xd9   : > { %1153 = vsyncadd (%p916_p9), %s749_s11, 4294966784  ;;  %s758_s21 = scalar_lea.sflag [#allocation9], %s748_s7 }
  0xda   : > { %1155 = dma.done.wait (%p916_p9), %s758_s21, 512  }
  0xdb   : > { %1157 = vsyncadd (%p916_p9), %s758_s21, 4294966784  ;;  %s26_s19 = sadd.s32 1, %s1189_s19   ;;  %s2282_s12 = smov %s1165_s13 }
  0xdc   : > { %p23_p10 = scmp.ge.s32.totalorder %s26_s19, 4   ;;  %s2283_s13 = smov %s1169_s14 }
  0xdd   : > { %s2284_s14 = smov %s1275_s27  ;;  %s2285_s15 = smov %s1177_s16 }
  0xde   : > { %s2105_s16 = smov 0   ;;  %s2286_s17 = smov %s1185_s18 }
  0xdf   : > { %s2287_s18 = smov %s2289_s22  ;;  %25 = sbr.rel (!%p23_p10) target bundleno = 11 (0xb), region = 107 }
  0xe4   :  { %763 = vsyncpa [#allocation3], 1 }
  0xe5   :  { %765 = vsyncpa [#allocation3 + $0x1], 1 }
  0xe6   :  { %766 = vsyncpa [#allocation6], 1 }
  0xe7   :  { %768 = vsyncpa [#allocation6 + $0x1], 1 }
  0xe8   :  { %769 = vsyncpa [#allocation4], 1 }
  0xe9   :  { %771 = vsyncpa [#allocation4 + $0x1], 1 }
  0xea   :  { %772 = vsyncpa [#allocation9], 1 }
  0xeb   :  { %774 = vsyncpa [#allocation9 + $0x1], 1 }

</bundles_post_ra>
